<compile_context>
chip_gen: v7x
topology: tpu7x:2x2x1
jax: 0.10.0
libtpu: 0.0.40
codegen_flags: <defaults>
</compile_context>

<pallas_src>
import functools
import math

import jax
import jax.numpy as jnp
from jax.experimental import pallas as pl
from jax.experimental.pallas import tpu as pltpu


def _build_pe_table(max_seq_len: int, d_model: int) -> jnp.ndarray:
    """Deterministic PE buffer, matching the PyTorch double loop exactly."""
    pos = jnp.arange(max_seq_len, dtype=jnp.float32)[:, None]           # (L, 1)
    i_even = jnp.arange(0, d_model, 2, dtype=jnp.float32)[None, :]      # (1, D/2)
    # sin terms use exponent 2*i/d_model, cos terms use 2*(i+1)/d_model
    sin_div = jnp.power(10000.0, 2.0 * i_even / d_model)                # (1, D/2)
    cos_div = jnp.power(10000.0, 2.0 * (i_even + 1.0) / d_model)        # (1, D/2)
    pe_sin = jnp.sin(pos / sin_div)                                     # (L, D/2)
    pe_cos = jnp.cos(pos / cos_div)                                     # (L, D/2)
    # interleave: even columns <- sin, odd columns <- cos
    pe = jnp.stack([pe_sin, pe_cos], axis=-1).reshape(max_seq_len, d_model)
    return pe.astype(jnp.float32)


def _pos_encoder_kernel(x_ref, pe_ref, o_ref, *, scale):
    # x_ref : (TB, TF) tile of the flattened (B, S*D) input
    # pe_ref: (1,  TF) shared positional-encoding tile (f32)
    # o_ref : (TB, TF) output tile
    x = x_ref[...].astype(jnp.float32)
    o_ref[...] = (x * scale + pe_ref[...]).astype(o_ref.dtype)


def _choose_lane_tile(total: int, max_elems: int) -> int:
    """Largest lane-axis tile <= max_elems.

    Prefers exact divisors of `total` that are multiples of 128 so blocks
    divide the array evenly; the full extent is always legal.
    """
    if total <= max_elems:
        return total
    cand = max(128, (max_elems // 128) * 128)
    c = cand
    while c >= 128:
        if total % c == 0:
            return c
        c -= 128
    # No friendly divisor: ragged last block (masked by Pallas).
    return cand


def positional_encoder(x: jnp.ndarray, pe_table: jnp.ndarray, d_model: int) -> jnp.ndarray:
    """x: (B, S, D); pe_table: (max_seq_len, D) f32. Returns (B, S, D) in x.dtype."""
    B, S, D = x.shape
    assert D == d_model, f"d_model mismatch: {D} vs {d_model}"
    assert S <= pe_table.shape[0], (
        f"seq_len {S} exceeds max_seq_len {pe_table.shape[0]}"
    )

    F = S * D
    scale = math.sqrt(d_model)

    # Flatten so the lane axis is S*D (large multiple of 128 for typical D),
    # giving unmasked, lane-dense output stores even when D < 128.
    x2 = x.reshape(B, F)
    pe2 = pe_table[:S, :].astype(jnp.float32).reshape(1, F)

    # Batch tile: full B when small (satisfies sublane rule), else 8.
    TB = B if B <= 8 else 8
    # Lane tile: ~1 MiB of f32 per x/out buffer.
    max_tf = max(128, ((1 << 20) // (4 * TB) // 128) * 128)
    TF = _choose_lane_tile(F, max_tf)

    nb = pl.cdiv(B, TB)
    nf = pl.cdiv(F, TF)

    kernel = functools.partial(_pos_encoder_kernel, scale=scale)

    # TODO(synk): dropout (p=0.1) is omitted (inference-mode identity); could be
    # added with pltpu.prng_seed + pltpu.stateful_bernoulli if training is needed.
    out2 = pl.pallas_call(
        kernel,
        out_shape=jax.ShapeDtypeStruct((B, F), x.dtype),
        grid=(nf, nb),  # F-tiles outer: PE tile index constant across inner batch axis
        in_specs=[
            pl.BlockSpec((TB, TF), lambda f, b: (b, f)),   # x tile
            pl.BlockSpec((1, TF), lambda f, b: (0, f)),    # shared PE tile (DMA skipped across b)
        ],
        out_specs=pl.BlockSpec((TB, TF), lambda f, b: (b, f)),
        compiler_params=pltpu.CompilerParams(
            dimension_semantics=("parallel", "parallel"),
        ),
    )(x2, pe2)

    return out2.reshape(B, S, D)


def positional_encoder_ref(x: jnp.ndarray, pe_table: jnp.ndarray, d_model: int) -> jnp.ndarray:
    """Pure-JAX reference of the PyTorch forward (eval mode)."""
    S = x.shape[1]
    out = x.astype(jnp.float32) * math.sqrt(d_model) + pe_table[None, :S, :]
    return out.astype(x.dtype)


if __name__ == "__main__":
    d_model = 32
    max_seq_len = 200
    batch, seq = 2, 8

    key = jax.random.PRNGKey(0)
    x = jax.random.normal(key, (batch, seq, d_model), dtype=jnp.float32)

    pe_table = _build_pe_table(max_seq_len, d_model)

    out = positional_encoder(x, pe_table, d_model)
    out = jax.block_until_ready(out)

    ref = positional_encoder_ref(x, pe_table, d_model)
    assert out.shape == (batch, seq, d_model)
    assert jnp.allclose(out, ref, atol=1e-5, rtol=1e-5), "mismatch vs reference"

    print("KERNEL_OK")
</pallas_src>

<mosaic_0001>
module attributes {stable_mosaic.version = 11 : i64} {
  func.func @_pos_encoder_kernel(%arg0: i32, %arg1: i32, %arg2: memref<2x256xf32, #tpu.memory_space<vmem>>, %arg3: memref<1x256xf32, #tpu.memory_space<vmem>>, %arg4: memref<2x256xf32, #tpu.memory_space<vmem>>) attributes {dimension_semantics = [#tpu.dimension_semantics<parallel>, #tpu.dimension_semantics<parallel>], iteration_bounds = array<i64: 1, 1>, scalar_prefetch = 0 : i64, scratch_operands = 0 : i64, tpu.core_type = #tpu.core_type<tc>, window_params = [{transform_indices = @transform_0, window_bounds = array<i64: 2, 256>}, {transform_indices = @transform_1, window_bounds = array<i64: 1, 256>}, {transform_indices = @transform_2, window_bounds = array<i64: 2, 256>}]} {
    %c0 = arith.constant 0 : index
    %c0_0 = arith.constant 0 : index
    %0 = vector.load %arg2[%c0, %c0_0] : memref<2x256xf32, #tpu.memory_space<vmem>>, vector<2x256xf32>
    %cst = arith.constant 5.65685415 : f32
    %1 = vector.broadcast %cst : f32 to vector<2x256xf32>
    %2 = arith.mulf %0, %1 : vector<2x256xf32>
    %c0_1 = arith.constant 0 : index
    %c0_2 = arith.constant 0 : index
    %3 = vector.load %arg3[%c0_1, %c0_2] : memref<1x256xf32, #tpu.memory_space<vmem>>, vector<1x256xf32>
    %4 = vector.broadcast %3 : vector<1x256xf32> to vector<2x256xf32>
    %5 = arith.addf %2, %4 : vector<2x256xf32>
    %c0_3 = arith.constant 0 : index
    %c0_4 = arith.constant 0 : index
    %6 = vector.load %arg4[%c0_3, %c0_4] : memref<2x256xf32, #tpu.memory_space<vmem>>, vector<2x256xf32>
    tpu.vector_store %arg4[%c0_3, %c0_4], %5 {strides = array<i32>} : memref<2x256xf32, #tpu.memory_space<vmem>>, vector<2x256xf32>,
    return
  }
  func.func @transform_0(%arg0: i32, %arg1: i32) -> (i32, i32) {
    %c0_i32 = arith.constant 0 : i32
    return %arg1, %arg0 : i32, i32
  }
  func.func @transform_1(%arg0: i32, %arg1: i32) -> (i32, i32) {
    %c0_i32 = arith.constant 0 : i32
    %c0_i32_0 = arith.constant 0 : i32
    return %c0_i32, %arg0 : i32, i32
  }
  func.func @transform_2(%arg0: i32, %arg1: i32) -> (i32, i32) {
    %c0_i32 = arith.constant 0 : i32
    return %arg1, %arg0 : i32, i32
  }
}

</mosaic_0001>

<bundles_post_ra>
// kernel: tpu_custom_call.1
= control target key start
LH: loop header
LB: loop body
LE: loop exit
PB: predicated region body
PF: predicated region fallthrough
CT: control target
= control target key end

     0   :  { %7 = vsyncpa [#allocation3], 0  ;;  %s158_s0 = inlined_call_operand.hbm [shape: f32[2,256], index: 0, kind: input, shape index: {}]   ;;  %s159_s1 = inlined_call_operand.vmem [shape: f32[1,256], index: 1, kind: input, shape index: {}]   ;;  %s160_s2 = inlined_call_operand.hbm [shape: f32[2,256], index: 2, kind: output, shape index: {}]  }
   0x1   :  { %8 = vsyncpa [#allocation4], 0  ;;  %s113_s9 = smov [#allocation2]   ;;  %s65_s13 = scalar_lea.hbm %s158_s0, 64 }
   0x2   :  { %s15_s10 = sshll.u32 %s113_s9, 4  ;;  %p66_p0 = scmp.ne.s32.totalorder %s158_s0, %s65_s13  ;;  %s16_s10 = int_to_ptr.vmem [resolvable:$true] %s15_s10 }
   0x3   :  { %p69_p1 = scmp.lt.u32.totalorder %s65_s13, %s158_s0 }
   0x5   :  { %p71_p2 = pnand %p69_p1, %p66_p0 }
   0x7   :  { %74 = shalt.err (!%p71_p2)
}
   0x8   :  { %s75_s18 = scalar_lea.vmem %s16_s10, 64  ;;  %p80_p4 = scmp.lt.s32.totalorder %s16_s10, %s16_s10 }
   0x9   :  { %p76_p3 = scmp.ne.s32.totalorder %s16_s10, %s75_s18  ;;  %p81_p5 = scmp.lt.s32.totalorder %s75_s18, %s75_s18 }
   0xb   :  { %p82_p6 = por %p81_p5, %p80_p4 }
   0xd   :  { %p83_p7 = pnand %p82_p6, %p76_p3 }
   0xf   :  { %86 = shalt.err (!%p83_p7)
}
  0x10   :  { %18 = dma.hbm_to_vmem [thread:$0]  %s158_s0, 64, %s16_s10, [#allocation3]  }
  0x11   :  { %109 = dma.done.wait [#allocation3], 64  }
  0x12   :  { %110 = vsyncadd [#allocation3], 4294967232  ;;  %v28_v0 = vlaneseq  ;;  %v114_v1 = vmov 1983009808   ;;  %v24_v7 = vld [vmem:[#allocation2] sm:$0xf] }
  0x13   :  { %v38_v2 = vunpack.c.l.s4 %v114_v1  ;;  %v26_v8 = vld [vmem:[%s159_s1] sm:$0x3]  ;;  %v25_v12 = vmul.f32 5.656854, %v24_v7  ;;  %s115_s0 = smov [#allocation5]  }
  0x14   :  { %v29_v3 = vshrl.u32 %v28_v0, 7  ;;  %s53_s23 = sshll.u32 %s115_s0, 4  ;;  %s54_s23 = int_to_ptr.vmem [resolvable:$true] %s53_s23 }
  0x15   :  { %v39_v6 = vunpack.c.0.s8 %v38_v2  ;;  %s87_s24 = scalar_lea.vmem %s54_s23, 64  ;;  %p92_p9 = scmp.lt.s32.totalorder %s54_s23, %s54_s23 }
  0x16   :  { %v30_v4 = vsub.s32 0, %v29_v3  ;;  %v34_v5 = vsub.s32 1, %v29_v3  ;;  %p88_p8 = scmp.ne.s32.totalorder %s54_s23, %s87_s24  ;;  %p93_p10 = scmp.lt.s32.totalorder %s87_s24, %s87_s24 }
  0x17   :  { %v42_v11 = vsub.s32 %v39_v6, %v29_v3 }
  0x18   :  { %v31_v9 = vrot.slane %v26_v8, %v30_v4  ;;  %v35_v10 = vrot.slane %v26_v8, %v34_v5  ;;  %p94_p11 = por %p93_p10, %p92_p9 }
  0x1a   :  { %v36_v13 = vcombine.low %v31_v9, %v35_v10  ;;  %p95_p12 = pnand %p94_p11, %p88_p8 }
  0x1c   :  { %v43_v14 = vrot.slane %v36_v13, %v42_v11 }
  0x1e   :  { %v45_v15 = vadd.f32 %v43_v14, %v25_v12 }
  0x20   :  { %46 = vst [vmem:[#allocation5] sm:$0xf] %v45_v15 }
  0x21   :  { %98 = shalt.err (!%p95_p12)
}
  0x22   :  { %s99_s26 = scalar_lea.hbm %s160_s2, 64 }
  0x23   :  { %p100_p13 = scmp.ne.s32.totalorder %s160_s2, %s99_s26  ;;  %p103_p0 = scmp.lt.u32.totalorder %s99_s26, %s160_s2 }
  0x25   :  { %p105_p1 = pnand %p103_p0, %p100_p13 }
  0x27   :  { %108 = shalt.err (!%p105_p1)
}
  0x28   :  { %56 = dma.vmem_to_hbm [thread:$0]  %s54_s23, 64, %s160_s2, [#allocation4]  }
  0x29   :  { %111 = dma.done.wait [#allocation4], 64  }
  0x2a   :  { %112 = vsyncadd [#allocation4], 4294967232 }
  0x2b   :  { %60 = vsyncpa [#allocation3], 1 }
  0x2c   :  { %61 = vsyncpa [#allocation4], 1 }

</bundles_post_ra>
